<compile_context>
chip_gen: v5e
topology: v5e:2x2
jax: 0.10.0
libtpu: 0.0.40
codegen_flags: <defaults>
</compile_context>

<pallas_src>
import math

import jax
import jax.numpy as jnp
from jax.experimental import pallas as pl
from jax.experimental.pallas import tpu as pltpu


def _drop_path_kernel(mask_ref, x_ref, o_ref):
    # mask_ref: (TB, 1) per-sample scale tile (0.0 or 1/keep_prob), in x.dtype
    # x_ref / o_ref: (TB, TC) lane-dense tiles of the flattened input / output
    o_ref[...] = x_ref[...] * mask_ref[...]


def _round_up(a, m):
    return ((a + m - 1) // m) * m


def _sublane_granule(dtype):
    # Packed sublane granularity: 32-bit -> 8, 16-bit -> 16, 8-bit -> 32.
    itemsize = jnp.dtype(dtype).itemsize
    return max(8, 32 // itemsize)


def _pick_tiles(B, F, itemsize, sub):
    """Choose (TB, TC) tile sizes for the flattened (B, F) array."""
    target_bytes = 4 * 1024 * 1024          # per-buffer budget (~4 MiB)
    row_bytes = F * itemsize
    tb_min = B if B <= sub else sub          # smallest batch granule we'd use

    if tb_min * row_bytes <= target_bytes:
        # Case 1: full feature rows fit -> TC = F, contiguous per-tile DMA.
        max_rows = max(1, target_bytes // row_bytes)
        TB = min(B, max_rows)
        if B > sub:
            TB = max(sub, (TB // sub) * sub)
            if TB >= B and B >= 2 * sub:
                # Keep >= 2 batch blocks so v7x's second TensorCore isn't idle.
                TB = min(B, _round_up((B + 1) // 2, sub))
        return TB, F

    # Case 2: even a minimal-granule tile of full rows is too big -> tile F.
    TB = tb_min
    cap = max(128, ((target_bytes // (TB * itemsize)) // 128) * 128)
    if F <= cap:
        return TB, F
    # Balanced chunking: minimizes the padded tail of the last feature block.
    n_chunks = pl.cdiv(F, cap)
    TC = min(cap, _round_up(pl.cdiv(F, n_chunks), 128))
    return TB, TC


def drop_path(x, drop_prob: float = 0.0, training: bool = False, *,
              key=None, donate_x: bool = False):
    """Pallas DropPath. Matches torch drop_path() forward semantics."""
    if drop_prob == 0.0 or not training:
        return x
    if not (0.0 <= drop_prob < 1.0):
        # drop_prob == 1.0 would give keep_prob == 0 and a NaN rescale; guard it.
        raise ValueError(f"drop_path: drop_prob must be in [0, 1), got {drop_prob}")
    if key is None:
        raise ValueError(
            "drop_path: a PRNG `key` is required when training with drop_prob > 0 "
            "(otherwise every call would draw the identical per-sample mask).")

    keep_prob = 1.0 - drop_prob
    B = x.shape[0]
    F = math.prod(x.shape[1:])

    # Per-sample mask with 1/keep_prob pre-folded: values are 0.0 or 1/keep_prob.
    # (Cast to x.dtype matches PyTorch, which also rescales in the tensor dtype.)
    rand = jax.random.uniform(key, (B,), dtype=jnp.float32)
    scale = (jnp.floor(keep_prob + rand) * (1.0 / keep_prob)).astype(x.dtype)
    scale = scale.reshape(B, 1)

    x2d = x.reshape(B, F)  # free reshape (contiguous)
    itemsize = jnp.dtype(x.dtype).itemsize
    sub = _sublane_granule(x.dtype)
    TB, TC = _pick_tiles(B, F, itemsize, sub)
    grid = (pl.cdiv(B, TB), pl.cdiv(F, TC))

    call_kwargs = {}
    if donate_x:
        # x2d is operand index 1 (after scale); reuse its buffer for output 0.
        call_kwargs["input_output_aliases"] = {1: 0}

    out2d = pl.pallas_call(
        _drop_path_kernel,
        out_shape=jax.ShapeDtypeStruct((B, F), x.dtype),
        grid=grid,
        in_specs=[
            pl.BlockSpec((TB, 1), lambda i, j: (i, 0)),    # per-sample scale
            pl.BlockSpec((TB, TC), lambda i, j: (i, j)),   # x tile
        ],
        out_specs=pl.BlockSpec((TB, TC), lambda i, j: (i, j)),
        compiler_params=pltpu.CompilerParams(
            dimension_semantics=("parallel", "parallel"),
            # 4 MiB tiles x (2 in-bufs + 2 out-bufs) = 16 MiB; v5e's scoped
            # default is only 16 MiB, so raise it explicitly (safe everywhere).
            vmem_limit_bytes=32 * 1024 * 1024),
        **call_kwargs,
    )(scale, x2d)
    return out2d.reshape(x.shape)


class DropPath:
    """Drop paths (Stochastic Depth) per sample."""

    def __init__(self, drop_prob=None):
        self.drop_prob = drop_prob if drop_prob is not None else 0.0
        self.training = True

    def __call__(self, x, *, key=None):
        return drop_path(x, self.drop_prob, self.training, key=key)


if __name__ == "__main__":
    root = jax.random.PRNGKey(0)
    k_x, k_drop, k_x2, k_drop2 = jax.random.split(root, 4)

    # --- Test 1: small ViT-like shapes, f32: batch=2, seq=8, hidden=32 -------
    B, N, C = 2, 8, 32
    x = jax.random.normal(k_x, (B, N, C), dtype=jnp.float32)

    drop_prob = 0.25
    module = DropPath(drop_prob)

    out = jax.block_until_ready(module(x, key=k_drop))

    keep_prob = 1.0 - drop_prob
    rand = jax.random.uniform(k_drop, (B,), dtype=jnp.float32)
    mask = jnp.floor(keep_prob + rand).reshape(B, 1, 1)
    ref = x / keep_prob * mask
    assert out.shape == x.shape and out.dtype == x.dtype
    assert jnp.allclose(out, ref, atol=1e-6, rtol=1e-5)

    # Eval path: identity (matches `if drop_prob == 0.0 or not training`)
    module.training = False
    out_eval = jax.block_until_ready(module(x, key=k_drop))
    assert jnp.array_equal(out_eval, x)

    # --- Test 2: bf16, larger batch (exercises sublane-granule TB rounding) --
    B2, N2, C2 = 16, 8, 32
    x2 = jax.random.normal(k_x2, (B2, N2, C2), dtype=jnp.bfloat16)
    out2 = jax.block_until_ready(drop_path(x2, 0.25, True, key=k_drop2))
    rand2 = jax.random.uniform(k_drop2, (B2,), dtype=jnp.float32)
    scale2 = (jnp.floor(0.75 + rand2) * (1.0 / 0.75)).astype(jnp.bfloat16)
    ref2 = x2 * scale2.reshape(B2, 1, 1)
    assert out2.shape == x2.shape and out2.dtype == x2.dtype
    assert jnp.allclose(out2.astype(jnp.float32), ref2.astype(jnp.float32),
                        atol=1e-2, rtol=1e-2)

    print("KERNEL_OK")
</pallas_src>

<mosaic_0001>
module attributes {stable_mosaic.version = 11 : i64} {
  func.func @_drop_path_kernel(%arg0: i32, %arg1: i32, %arg2: memref<2x1xf32, #tpu.memory_space<vmem>>, %arg3: memref<2x256xf32, #tpu.memory_space<vmem>>, %arg4: memref<2x256xf32, #tpu.memory_space<vmem>>) attributes {dimension_semantics = [#tpu.dimension_semantics<parallel>, #tpu.dimension_semantics<parallel>], iteration_bounds = array<i64: 1, 1>, scalar_prefetch = 0 : i64, scratch_operands = 0 : i64, tpu.core_type = #tpu.core_type<tc>, window_params = [{transform_indices = @transform_0, window_bounds = array<i64: 2, 1>}, {transform_indices = @transform_1, window_bounds = array<i64: 2, 256>}, {transform_indices = @transform_2, window_bounds = array<i64: 2, 256>}]} {
    %c0 = arith.constant 0 : index
    %c0_0 = arith.constant 0 : index
    %0 = vector.load %arg3[%c0, %c0_0] : memref<2x256xf32, #tpu.memory_space<vmem>>, vector<2x256xf32>
    %c0_1 = arith.constant 0 : index
    %c0_2 = arith.constant 0 : index
    %1 = vector.load %arg2[%c0_1, %c0_2] : memref<2x1xf32, #tpu.memory_space<vmem>>, vector<2x1xf32>
    %2 = vector.broadcast %1 : vector<2x1xf32> to vector<2x256xf32>
    %3 = arith.mulf %0, %2 : vector<2x256xf32>
    %c0_3 = arith.constant 0 : index
    %c0_4 = arith.constant 0 : index
    %4 = vector.load %arg4[%c0_3, %c0_4] : memref<2x256xf32, #tpu.memory_space<vmem>>, vector<2x256xf32>
    tpu.vector_store %arg4[%c0_3, %c0_4], %3 {strides = array<i32>} : memref<2x256xf32, #tpu.memory_space<vmem>>, vector<2x256xf32>,
    return
  }
  func.func @transform_0(%arg0: i32, %arg1: i32) -> (i32, i32) {
    %c0_i32 = arith.constant 0 : i32
    %c0_i32_0 = arith.constant 0 : i32
    return %arg0, %c0_i32 : i32, i32
  }
  func.func @transform_1(%arg0: i32, %arg1: i32) -> (i32, i32) {
    %c0_i32 = arith.constant 0 : i32
    return %arg0, %arg1 : i32, i32
  }
  func.func @transform_2(%arg0: i32, %arg1: i32) -> (i32, i32) {
    %c0_i32 = arith.constant 0 : i32
    return %arg0, %arg1 : i32, i32
  }
}

</mosaic_0001>

<bundles_post_ra>
// kernel: tpu_custom_call.1
= control target key start
LH: loop header
LB: loop body
LE: loop exit
PB: predicated region body
PF: predicated region fallthrough
CT: control target
= control target key end

     0   :  { %7 = vsyncpa [#allocation3], 0  ;;  %s141_s0 = inlined_call_operand.vmem [shape: f32[2,1], index: 0, kind: input, shape index: {}]   ;;  %s142_s1 = inlined_call_operand.hbm [shape: f32[2,256], index: 1, kind: input, shape index: {}]   ;;  %s143_s2 = inlined_call_operand.hbm [shape: f32[2,256], index: 2, kind: output, shape index: {}]  }
   0x1   :  { %8 = vsyncpa [#allocation4], 0  ;;  %s16_s11 = sshll.u32 %s142_s1, 4  ;;  %s113_s12 = smov [#allocation2]   ;;  %s17_s11 = int_to_ptr.hbm [resolvable:$true] %s16_s11 }
   0x2   :  { %s18_s13 = sshll.u32 %s113_s12, 4  ;;  %s19_s13 = int_to_ptr.vmem [resolvable:$true] %s18_s13 }
   0x3   :  { %21 = dma.hbm_to_vmem [thread:$0]  %s17_s11, 64, %s19_s13, [#allocation3]  }
   0x4   :  { %109 = dma.done.wait [#allocation3], 64  }
   0x5   :  { %110 = vsyncadd [#allocation3], 4294967232  ;;  %v114_v0 = vmov 0   ;;  %v27_v1 = vld [vmem:[%s141_s0] sm:$0x3]  ;;  %s116_s1 = smov [#allocation5]  }
   0x6   :  { %60 = vset.pattern.permute.xlu0 %v114_v0  ;;  %v115_v2 = vmov 269488144   ;;  %v26_v6 = vld [vmem:[#allocation2] sm:$0xf]  ;;  %s44_s16 = sshll.u32 %s116_s1, 4  ;;  %s46_s19 = sshll.u32 %s143_s2, 4  ;;  %s45_s16 = int_to_ptr.vmem [resolvable:$true] %s44_s16  ;;  %s47_s19 = int_to_ptr.hbm [resolvable:$true] %s46_s19 }
   0x7   :  { %30 = vperm.xlu0 %60, %v27_v1   ;;  %v33_v3 = vunpack.c.l.s4 %v115_v2 }
   0x9   :  { %v34_v4 = vunpack.c.0.s8 %v33_v3 }
  0x79   :  { %v31_v5 = vpop.permute.xlu0 %30 }
  0x7a   :  { %v35_v7 = vperm.slane %v31_v5, %v34_v4 }
  0x7c   :  { %v37_v8 = vmul.f32 %v35_v7, %v26_v6 }
  0x7e   :  { %38 = vst [vmem:[#allocation5] sm:$0xf] %v37_v8 }
  0x7f   :  { %49 = dma.vmem_to_hbm [thread:$0]  %s45_s16, 64, %s47_s19, [#allocation4]  }
  0x80   :  { %111 = dma.done.wait [#allocation4], 64  }
  0x81   :  { %112 = vsyncadd [#allocation4], 4294967232 }
  0x82   :  { %54 = vsyncpa [#allocation3], 1 }
  0x83   :  { %55 = vsyncpa [#allocation4], 1 }

</bundles_post_ra>
